<compile_context>
chip_gen: v7x
topology: tpu7x:2x2x1
jax: 0.10.0
libtpu: 0.0.40
codegen_flags: <defaults>
</compile_context>

<pallas_src>
import numpy as np
import jax
import jax.numpy as jnp
from jax import lax
from jax.experimental import pallas as pl
from jax.experimental.pallas import tpu as pltpu


def _round_up(x, m):
    return (x + m - 1) // m * m


def _gru_kernel(x_ref, mask_ref, h0_ref, wi_ref, wh_ref, bfold_ref, bhn_ref,
                out_ref, state_ref, xw_s, h_scratch):
    """One grid step processes `block_t` timesteps of the GRU recurrence.

    x_ref    : [block_t*Bp, Dp]   bf16  time-major input rows for this block (streamed)
    mask_ref : [block_t*Bp, 1]    f32   1.0 while t < seq_len else 0.0 (streamed)
    h0_ref   : [Bp, Hp]           f32   initial hidden state (resident)
    wi_ref   : [Dp, 3*Hp]         bf16  fused input->hidden weights r|z|n (resident)
    wh_ref   : [Hp, 3*Hp]         bf16  fused hidden->hidden weights r|z|n (resident)
    bfold_ref: [1, 3*Hp]          f32   b_ir+b_hr | b_iz+b_hz | b_in (resident)
    bhn_ref  : [1, Hp]            f32   b_hn (must stay inside the r*(...) gating)
    out_ref  : [block_t*Bp, Hp]   f32   per-step outputs (zero past seq_len)
    state_ref: [Bp, Hp]           f32   final hidden state (written on last grid step)
    xw_s     : [block_t*Bp, 3*Hp] f32   scratch: block-level input projection
    h_scratch: [Bp, Hp]           f32   hidden state carried across grid steps
    """
    tb = pl.program_id(0)
    bp, hp = h_scratch.shape
    tt = x_ref.shape[0] // bp

    @pl.when(tb == 0)
    def _():
        h_scratch[...] = h0_ref[...]

    # Hoisted input projection for all block_t timesteps: one wide bf16 MXU matmul
    # (block_t*Bp rows) with f32 accumulation; the foldable biases are added here.
    xw_s[...] = jnp.dot(x_ref[...], wi_ref[...],
                        preferred_element_type=jnp.float32) + bfold_ref[...]

    wh = wh_ref[...]          # bf16 weight, hoisted out of the time loop
    b_hn = bhn_ref[...]       # [1, Hp] f32

    def step(i, h):
        row = pl.multiple_of(i * bp, 8)                               # sublane-aligned
        xw = xw_s[pl.ds(row, bp), :]                                  # [Bp, 3Hp] f32
        m = mask_ref[pl.ds(row, bp), :]                               # [Bp, 1]   f32
        # Serial critical path: one fused bf16 MXU matmul per timestep, f32 accumulate.
        hh = jnp.dot(h.astype(jnp.bfloat16), wh,
                     preferred_element_type=jnp.float32)              # [Bp, 3Hp]
        r = jax.nn.sigmoid(xw[:, :hp] + hh[:, :hp])
        z = jax.nn.sigmoid(xw[:, hp:2 * hp] + hh[:, hp:2 * hp])
        n = jnp.tanh(xw[:, 2 * hp:] + r * (hh[:, 2 * hp:] + b_hn))
        h_new = n + z * (h - n)                                       # == (1-z)*n + z*h
        out_ref[pl.ds(row, bp), :] = (m * h_new).astype(out_ref.dtype)  # m*h_upd == m*h_new
        return h + m * (h_new - h)                                    # freeze past seq_len

    h_final = lax.fori_loop(0, tt, step, h_scratch[...], unroll=True)
    h_scratch[...] = h_final

    @pl.when(tb == pl.num_programs(0) - 1)
    def _():
        state_ref[...] = h_final.astype(state_ref.dtype)


def dynamic_gru_pallas(x_btd, seq_len, w_ih, w_hh, b_ih, b_hh, h0=None, *, block_t=32):
    """Single-layer, unidirectional, batch-first GRU with packed-sequence semantics.

    x_btd  : [B, T, D] float32
    seq_len: [B] int   valid lengths
    w_ih   : [3H, D], w_hh: [3H, H], b_ih/b_hh: [3H]   (PyTorch nn.GRU layout, gates r|z|n)
    h0     : [1, B, H] or None (zero initial state)
    Returns: output [B, T, H] (zeros past each row's seq_len), state [1, B, H].
    """
    B, T, D = x_btd.shape
    H = w_hh.shape[1]

    Bp = _round_up(B, 8)                    # fill sublanes
    Hp = _round_up(H, 128)                  # lane-dense stores + vreg-aligned gate slices
    Dp = _round_up(D, 128)                  # lane-aligned input features
    Tp = _round_up(max(T, 1), block_t)      # grid >= 1 so the final state is always written

    # --- Repack weights: gate-concatenated (r|z|n), zero-padded, bf16 for the MXU. ---
    wi_g = [jnp.pad(w_ih[g * H:(g + 1) * H].T, ((0, Dp - D), (0, Hp - H))) for g in range(3)]
    wh_g = [jnp.pad(w_hh[g * H:(g + 1) * H].T, ((0, Hp - H), (0, Hp - H))) for g in range(3)]
    wi_cat = jnp.concatenate(wi_g, axis=1).astype(jnp.bfloat16)        # [Dp, 3Hp]
    wh_cat = jnp.concatenate(wh_g, axis=1).astype(jnp.bfloat16)        # [Hp, 3Hp]

    def pad_h(v):
        return jnp.pad(v, (0, Hp - H))

    # Fold b_ir+b_hr, b_iz+b_hz, b_in into the block input projection; b_hn stays in-loop.
    b_fold = jnp.concatenate([pad_h(b_ih[0:H] + b_hh[0:H]),
                              pad_h(b_ih[H:2 * H] + b_hh[H:2 * H]),
                              pad_h(b_ih[2 * H:3 * H])]).astype(jnp.float32)[None, :]  # [1,3Hp]
    b_hn = pad_h(b_hh[2 * H:3 * H]).astype(jnp.float32)[None, :]                       # [1,Hp]

    # --- Activations: pad batch/time/features, transpose x once to time-major (cheap: D
    #     columns, not 3Hp), flatten (T, B) -> rows so kernel tiles stay lane-dense. ---
    x_pad = jnp.pad(x_btd, ((0, Bp - B), (0, Tp - T), (0, Dp - D))).astype(jnp.bfloat16)
    x_rows = jnp.transpose(x_pad, (1, 0, 2)).reshape(Tp * Bp, Dp)      # [Tp*Bp, Dp] bf16

    seq_pad = jnp.pad(jnp.asarray(seq_len).astype(jnp.int32), (0, Bp - B))  # padded rows: 0
    mask = (jnp.arange(Tp, dtype=jnp.int32)[:, None] < seq_pad[None, :]).astype(jnp.float32)
    mask_rows = mask.reshape(Tp * Bp, 1)                               # exact 0.0 / 1.0 f32

    if h0 is None:
        h0_p = jnp.zeros((Bp, Hp), jnp.float32)
    else:
        h0_p = jnp.pad(h0[0].astype(jnp.float32), ((0, Bp - B), (0, Hp - H)))

    rows = block_t * Bp
    # VMEM budget (flat sum; streams double-buffered).  Used only to set an explicit limit
    # with headroom so larger block_t does not trip the per-chip scoped-VMEM default.
    vmem_bytes = (2 * rows * Dp * 2 + 2 * rows * 4 + 2 * rows * Hp * 4       # streams
                  + 2 * (Dp * 3 * Hp * 2 + Hp * 3 * Hp * 2)                  # resident weights
                  + 2 * (4 * Hp * 4 + Bp * Hp * 4) + 2 * Bp * Hp * 4         # biases/h0/state
                  + rows * 3 * Hp * 4 + Bp * Hp * 4)                         # scratch
    vmem_limit = int(min(max(2 * vmem_bytes + (2 << 20), 32 << 20), 100 << 20))

    grid = (Tp // block_t,)
    out_rows, state = pl.pallas_call(
        _gru_kernel,
        out_shape=(jax.ShapeDtypeStruct((Tp * Bp, Hp), jnp.float32),
                   jax.ShapeDtypeStruct((Bp, Hp), jnp.float32)),
        grid_spec=pltpu.PrefetchScalarGridSpec(
            num_scalar_prefetch=0,
            grid=grid,
            in_specs=[
                pl.BlockSpec((rows, Dp), lambda t: (t, 0)),        # x       (streamed, bf16)
                pl.BlockSpec((rows, 1), lambda t: (t, 0)),         # mask    (streamed)
                pl.BlockSpec((Bp, Hp), lambda t: (0, 0)),          # h0      (resident)
                pl.BlockSpec((Dp, 3 * Hp), lambda t: (0, 0)),      # wi_cat  (resident, bf16)
                pl.BlockSpec((Hp, 3 * Hp), lambda t: (0, 0)),      # wh_cat  (resident, bf16)
                pl.BlockSpec((1, 3 * Hp), lambda t: (0, 0)),       # b_fold  (resident)
                pl.BlockSpec((1, Hp), lambda t: (0, 0)),           # b_hn    (resident)
            ],
            out_specs=[
                pl.BlockSpec((rows, Hp), lambda t: (t, 0)),        # per-step outputs
                pl.BlockSpec((Bp, Hp), lambda t: (0, 0)),          # final state
            ],
            scratch_shapes=[
                pltpu.VMEM((rows, 3 * Hp), jnp.float32),           # block input projection
                pltpu.VMEM((Bp, Hp), jnp.float32),                 # carried hidden state
            ],
        ),
        compiler_params=pltpu.CompilerParams(
            dimension_semantics=("arbitrary",),                    # time is a true recurrence
            vmem_limit_bytes=vmem_limit,
        ),
    )(x_rows, mask_rows, h0_p, wi_cat, wh_cat, b_fold, b_hn)

    out_tbh = out_rows.reshape(Tp, Bp, Hp)
    out_bth = jnp.transpose(out_tbh[:T, :B, :H], (1, 0, 2))            # [B, T, H]
    state_out = state[None, :B, :H]                                    # [1, B, H]
    return out_bth, state_out


def gru_ref(x_btd, seq_len, w_ih, w_hh, b_ih, b_hh, h0=None, matmul_dtype=jnp.float32):
    """Pure-JAX reference (PyTorch GRU math + packed-sequence semantics).

    matmul_dtype=jnp.bfloat16 emulates the kernel's bf16-operand / f32-accumulate matmuls.
    """
    B, T, D = x_btd.shape
    H = w_hh.shape[1]
    if h0 is None:
        h0 = jnp.zeros((1, B, H), jnp.float32)
    wi = [w_ih[g * H:(g + 1) * H].T for g in range(3)]
    wh = [w_hh[g * H:(g + 1) * H].T for g in range(3)]
    bi = [b_ih[g * H:(g + 1) * H] for g in range(3)]
    bh = [b_hh[g * H:(g + 1) * H] for g in range(3)]

    def mm(a, b):
        return jnp.dot(a.astype(matmul_dtype), b.astype(matmul_dtype),
                       preferred_element_type=jnp.float32)

    def step(h, inp):
        x_t, t = inp
        r = jax.nn.sigmoid(mm(x_t, wi[0]) + bi[0] + bh[0] + mm(h, wh[0]))
        z = jax.nn.sigmoid(mm(x_t, wi[1]) + bi[1] + bh[1] + mm(h, wh[1]))
        n = jnp.tanh(mm(x_t, wi[2]) + bi[2] + r * (mm(h, wh[2]) + bh[2]))
        h_new = (1.0 - z) * n + z * h
        valid = (t < seq_len)[:, None]
        h_upd = jnp.where(valid, h_new, h)
        out = jnp.where(valid, h_upd, 0.0)
        return h_upd, out

    h_final, outs = lax.scan(step, h0[0].astype(jnp.float32),
                             (jnp.transpose(x_btd, (1, 0, 2)),
                              jnp.arange(T, dtype=jnp.int32)))
    return jnp.transpose(outs, (1, 0, 2)), h_final[None]


if __name__ == "__main__":
    # Small shapes consistent with the module: batch=4, seq=8, input_size=16, hidden_size=32.
    B, T, D, H = 4, 8, 16, 32
    key = jax.random.PRNGKey(0)
    k_x, k_wi, k_wh, k_bi, k_bh = jax.random.split(key, 5)

    x = jax.random.normal(k_x, (B, T, D), dtype=jnp.float32)
    seq_len = jnp.array([7, 5, 3, 6], dtype=jnp.int32)          # variable lengths, max < T

    # Deterministic parameter init (xavier-normal-ish gain=sqrt(2), PyTorch GRU shapes).
    gain = np.sqrt(2.0)
    w_ih = jax.random.normal(k_wi, (3 * H, D), jnp.float32) * gain * np.sqrt(2.0 / (3 * H + D))
    w_hh = jax.random.normal(k_wh, (3 * H, H), jnp.float32) * gain * np.sqrt(2.0 / (3 * H + H))
    b_ih = jax.random.normal(k_bi, (3 * H,), jnp.float32) * 0.1
    b_hh = jax.random.normal(k_bh, (3 * H,), jnp.float32) * 0.1

    # block_t=4 so the T=8 test exercises multiple grid steps (hidden-state carry + the
    # final-state guard across grid iterations); production default is block_t=32.
    run = jax.jit(lambda x_, s_, a, b, c, d: dynamic_gru_pallas(x_, s_, a, b, c, d, block_t=4))
    out_full, state = run(x, seq_len, w_ih, w_hh, b_ih, b_hh)
    out_full = jax.block_until_ready(out_full)
    state = jax.block_until_ready(state)

    # pad_packed_sequence truncates time to max(seq_len).
    t_max = int(jnp.max(seq_len))
    out = out_full[:, :t_max, :]                                  # [B, max(seq_len), H]

    # Structural check vs a reference emulating the kernel's bf16-MXU / f32-accumulate
    # numerics (tight-ish), plus a looser check vs the full-f32 reference (bf16 rounding
    # of weights/inputs on the MXU path requires relaxed tolerances).
    mix_out, mix_state = gru_ref(x, seq_len, w_ih, w_hh, b_ih, b_hh, matmul_dtype=jnp.bfloat16)
    np.testing.assert_allclose(np.asarray(out), np.asarray(mix_out[:, :t_max, :]),
                               rtol=1e-2, atol=1e-2)
    np.testing.assert_allclose(np.asarray(state), np.asarray(mix_state), rtol=1e-2, atol=1e-2)

    f32_out, f32_state = gru_ref(x, seq_len, w_ih, w_hh, b_ih, b_hh)
    np.testing.assert_allclose(np.asarray(out), np.asarray(f32_out[:, :t_max, :]),
                               rtol=5e-2, atol=5e-2)
    np.testing.assert_allclose(np.asarray(state), np.asarray(f32_state), rtol=5e-2, atol=5e-2)

    print("KERNEL_OK")
</pallas_src>

<mosaic_0001>
module attributes {stable_mosaic.version = 11 : i64} {
  func.func @_gru_kernel(%arg0: i32, %arg1: memref<32x128xbf16, #tpu.memory_space<vmem>>, %arg2: memref<32x1xf32, #tpu.memory_space<vmem>>, %arg3: memref<8x128xf32, #tpu.memory_space<vmem>>, %arg4: memref<128x384xbf16, #tpu.memory_space<vmem>>, %arg5: memref<128x384xbf16, #tpu.memory_space<vmem>>, %arg6: memref<1x384xf32, #tpu.memory_space<vmem>>, %arg7: memref<1x128xf32, #tpu.memory_space<vmem>>, %arg8: memref<32x128xf32, #tpu.memory_space<vmem>>, %arg9: memref<8x128xf32, #tpu.memory_space<vmem>>, %arg10: memref<32x384xf32, #tpu.memory_space<vmem>>, %arg11: memref<8x128xf32, #tpu.memory_space<vmem>>) attributes {dimension_semantics = [#tpu.dimension_semantics<arbitrary>], iteration_bounds = array<i64: 2>, scalar_prefetch = 0 : i64, scratch_operands = 2 : i64, tpu.core_type = #tpu.core_type<tc>, window_params = [{transform_indices = @transform_0, window_bounds = array<i64: 32, 128>}, {transform_indices = @transform_1, window_bounds = array<i64: 32, 1>}, {pipeline_mode = #tpu.pipeline_mode<synchronous>, transform_indices = @transform_2, window_bounds = array<i64: 8, 128>}, {pipeline_mode = #tpu.pipeline_mode<synchronous>, transform_indices = @transform_3, window_bounds = array<i64: 128, 384>}, {pipeline_mode = #tpu.pipeline_mode<synchronous>, transform_indices = @transform_4, window_bounds = array<i64: 128, 384>}, {pipeline_mode = #tpu.pipeline_mode<synchronous>, transform_indices = @transform_5, window_bounds = array<i64: 1, 384>}, {pipeline_mode = #tpu.pipeline_mode<synchronous>, transform_indices = @transform_6, window_bounds = array<i64: 1, 128>}, {transform_indices = @transform_7, window_bounds = array<i64: 32, 128>}, {pipeline_mode = #tpu.pipeline_mode<synchronous>, transform_indices = @transform_8, window_bounds = array<i64: 8, 128>}]} {
    %c0_i32 = arith.constant 0 : i32
    %0 = arith.cmpi eq, %arg0, %c0_i32 : i32
    %1 = arith.extui %0 : i1 to i32
    %c0_i32_0 = arith.constant 0 : i32
    %2 = arith.cmpi ne, %1, %c0_i32_0 : i32
    scf.if %2 {
      %c0_46 = arith.constant 0 : index
      %c0_47 = arith.constant 0 : index
      %185 = vector.load %arg3[%c0_46, %c0_47] : memref<8x128xf32, #tpu.memory_space<vmem>>, vector<8x128xf32>
      %c0_48 = arith.constant 0 : index
      %c0_49 = arith.constant 0 : index
      %186 = vector.load %arg11[%c0_48, %c0_49] : memref<8x128xf32, #tpu.memory_space<vmem>>, vector<8x128xf32>
      tpu.vector_store %arg11[%c0_48, %c0_49], %185 {strides = array<i32>} : memref<8x128xf32, #tpu.memory_space<vmem>>, vector<8x128xf32>,
    } else {
    }
    %c0 = arith.constant 0 : index
    %c0_1 = arith.constant 0 : index
    %3 = vector.load %arg1[%c0, %c0_1] : memref<32x128xbf16, #tpu.memory_space<vmem>>, vector<32x128xbf16>
    %c0_2 = arith.constant 0 : index
    %c0_3 = arith.constant 0 : index
    %4 = vector.load %arg4[%c0_2, %c0_3] : memref<128x384xbf16, #tpu.memory_space<vmem>>, vector<128x384xbf16>
    %cst = arith.constant dense<0.000000e+00> : vector<32x384xf32>
    %5 = tpu.matmul %3, %4, %cst {dimension_numbers = #tpu.dot_dimension_numbers<[1], [0], [0], [1], [0, 0, 1, 1], [], []>} : vector<32x128xbf16>, vector<128x384xbf16>, vector<32x384xf32> -> vector<32x384xf32>
    %c0_4 = arith.constant 0 : index
    %c0_5 = arith.constant 0 : index
    %6 = vector.load %arg6[%c0_4, %c0_5] : memref<1x384xf32, #tpu.memory_space<vmem>>, vector<1x384xf32>
    %7 = vector.broadcast %6 : vector<1x384xf32> to vector<32x384xf32>
    %8 = arith.addf %5, %7 : vector<32x384xf32>
    %c0_6 = arith.constant 0 : index
    %c0_7 = arith.constant 0 : index
    %9 = vector.load %arg10[%c0_6, %c0_7] : memref<32x384xf32, #tpu.memory_space<vmem>>, vector<32x384xf32>
    tpu.vector_store %arg10[%c0_6, %c0_7], %8 {strides = array<i32>} : memref<32x384xf32, #tpu.memory_space<vmem>>, vector<32x384xf32>,
    %c0_8 = arith.constant 0 : index
    %c0_9 = arith.constant 0 : index
    %10 = vector.load %arg5[%c0_8, %c0_9] : memref<128x384xbf16, #tpu.memory_space<vmem>>, vector<128x384xbf16>
    %c0_10 = arith.constant 0 : index
    %c0_11 = arith.constant 0 : index
    %11 = vector.load %arg7[%c0_10, %c0_11] : memref<1x128xf32, #tpu.memory_space<vmem>>, vector<1x128xf32>
    %c0_12 = arith.constant 0 : index
    %c0_13 = arith.constant 0 : index
    %12 = vector.load %arg11[%c0_12, %c0_13] : memref<8x128xf32, #tpu.memory_space<vmem>>, vector<8x128xf32>
    %c0_i32_14 = arith.constant 0 : i32
    %c8_i32 = arith.constant 8 : i32
    %13 = arith.muli %c0_i32_14, %c8_i32 : i32
    %14 = tpu.assume_multiple %13, 8 : i32
    %15 = arith.index_cast %14 : i32 to index
    %c0_15 = arith.constant 0 : index
    %16 = vector.load %arg10[%15, %c0_15] : memref<32x384xf32, #tpu.memory_space<vmem>>, vector<8x384xf32>
    %17 = arith.index_cast %14 : i32 to index
    %c0_16 = arith.constant 0 : index
    %18 = vector.load %arg2[%17, %c0_16] : memref<32x1xf32, #tpu.memory_space<vmem>>, vector<8x1xf32>
    %19 = arith.truncf %12 : vector<8x128xf32> to vector<8x128xbf16>
    %cst_17 = arith.constant dense<0.000000e+00> : vector<8x384xf32>
    %20 = tpu.matmul %19, %10, %cst_17 {dimension_numbers = #tpu.dot_dimension_numbers<[1], [0], [0], [1], [0, 0, 1, 1], [], []>} : vector<8x128xbf16>, vector<128x384xbf16>, vector<8x384xf32> -> vector<8x384xf32>
    %21 = vector.extract_strided_slice %16 {offsets = [0, 0], sizes = [8, 128], strides = [1, 1]} : vector<8x384xf32> to vector<8x128xf32>
    %22 = vector.extract_strided_slice %20 {offsets = [0, 0], sizes = [8, 128], strides = [1, 1]} : vector<8x384xf32> to vector<8x128xf32>
    %23 = arith.addf %21, %22 : vector<8x128xf32>
    %24 = arith.negf %23 : vector<8x128xf32>
    %25 = math.exp %24 : vector<8x128xf32>
    %cst_18 = arith.constant 1.000000e+00 : f32
    %26 = vector.broadcast %cst_18 : f32 to vector<8x128xf32>
    %27 = arith.addf %26, %25 : vector<8x128xf32>
    %28 = arith.divf %26, %27 : vector<8x128xf32>
    %29 = vector.extract_strided_slice %16 {offsets = [0, 128], sizes = [8, 128], strides = [1, 1]} : vector<8x384xf32> to vector<8x128xf32>
    %30 = vector.extract_strided_slice %20 {offsets = [0, 128], sizes = [8, 128], strides = [1, 1]} : vector<8x384xf32> to vector<8x128xf32>
    %31 = arith.addf %29, %30 : vector<8x128xf32>
    %32 = arith.negf %31 : vector<8x128xf32>
    %33 = math.exp %32 : vector<8x128xf32>
    %cst_19 = arith.constant 1.000000e+00 : f32
    %34 = vector.broadcast %cst_19 : f32 to vector<8x128xf32>
    %35 = arith.addf %34, %33 : vector<8x128xf32>
    %36 = arith.divf %34, %35 : vector<8x128xf32>
    %37 = vector.extract_strided_slice %16 {offsets = [0, 256], sizes = [8, 128], strides = [1, 1]} : vector<8x384xf32> to vector<8x128xf32>
    %38 = vector.extract_strided_slice %20 {offsets = [0, 256], sizes = [8, 128], strides = [1, 1]} : vector<8x384xf32> to vector<8x128xf32>
    %39 = vector.broadcast %11 : vector<1x128xf32> to vector<8x128xf32>
    %40 = arith.addf %38, %39 : vector<8x128xf32>
    %41 = arith.mulf %28, %40 : vector<8x128xf32>
    %42 = arith.addf %37, %41 : vector<8x128xf32>
    %43 = math.tanh %42 : vector<8x128xf32>
    %44 = arith.subf %12, %43 : vector<8x128xf32>
    %45 = arith.mulf %36, %44 : vector<8x128xf32>
    %46 = arith.addf %43, %45 : vector<8x128xf32>
    %47 = vector.broadcast %18 : vector<8x1xf32> to vector<8x128xf32>
    %48 = arith.mulf %47, %46 : vector<8x128xf32>
    %49 = arith.index_cast %14 : i32 to index
    %c0_20 = arith.constant 0 : index
    %50 = vector.load %arg8[%49, %c0_20] : memref<32x128xf32, #tpu.memory_space<vmem>>, vector<8x128xf32>
    tpu.vector_store %arg8[%49, %c0_20], %48 {strides = array<i32>} : memref<32x128xf32, #tpu.memory_space<vmem>>, vector<8x128xf32>,
    %51 = arith.subf %46, %12 : vector<8x128xf32>
    %52 = vector.broadcast %18 : vector<8x1xf32> to vector<8x128xf32>
    %53 = arith.mulf %52, %51 : vector<8x128xf32>
    %54 = arith.addf %12, %53 : vector<8x128xf32>
    %c1_i32 = arith.constant 1 : i32
    %c8_i32_21 = arith.constant 8 : i32
    %55 = arith.muli %c1_i32, %c8_i32_21 : i32
    %56 = tpu.assume_multiple %55, 8 : i32
    %57 = arith.index_cast %56 : i32 to index
    %c0_22 = arith.constant 0 : index
    %58 = vector.load %arg10[%57, %c0_22] : memref<32x384xf32, #tpu.memory_space<vmem>>, vector<8x384xf32>
    %59 = arith.index_cast %56 : i32 to index
    %c0_23 = arith.constant 0 : index
    %60 = vector.load %arg2[%59, %c0_23] : memref<32x1xf32, #tpu.memory_space<vmem>>, vector<8x1xf32>
    %61 = arith.truncf %54 : vector<8x128xf32> to vector<8x128xbf16>
    %cst_24 = arith.constant dense<0.000000e+00> : vector<8x384xf32>
    %62 = tpu.matmul %61, %10, %cst_24 {dimension_numbers = #tpu.dot_dimension_numbers<[1], [0], [0], [1], [0, 0, 1, 1], [], []>} : vector<8x128xbf16>, vector<128x384xbf16>, vector<8x384xf32> -> vector<8x384xf32>
    %63 = vector.extract_strided_slice %58 {offsets = [0, 0], sizes = [8, 128], strides = [1, 1]} : vector<8x384xf32> to vector<8x128xf32>
    %64 = vector.extract_strided_slice %62 {offsets = [0, 0], sizes = [8, 128], strides = [1, 1]} : vector<8x384xf32> to vector<8x128xf32>
    %65 = arith.addf %63, %64 : vector<8x128xf32>
    %66 = arith.negf %65 : vector<8x128xf32>
    %67 = math.exp %66 : vector<8x128xf32>
    %cst_25 = arith.constant 1.000000e+00 : f32
    %68 = vector.broadcast %cst_25 : f32 to vector<8x128xf32>
    %69 = arith.addf %68, %67 : vector<8x128xf32>
    %70 = arith.divf %68, %69 : vector<8x128xf32>
    %71 = vector.extract_strided_slice %58 {offsets = [0, 128], sizes = [8, 128], strides = [1, 1]} : vector<8x384xf32> to vector<8x128xf32>
    %72 = vector.extract_strided_slice %62 {offsets = [0, 128], sizes = [8, 128], strides = [1, 1]} : vector<8x384xf32> to vector<8x128xf32>
    %73 = arith.addf %71, %72 : vector<8x128xf32>
    %74 = arith.negf %73 : vector<8x128xf32>
    %75 = math.exp %74 : vector<8x128xf32>
    %cst_26 = arith.constant 1.000000e+00 : f32
    %76 = vector.broadcast %cst_26 : f32 to vector<8x128xf32>
    %77 = arith.addf %76, %75 : vector<8x128xf32>
    %78 = arith.divf %76, %77 : vector<8x128xf32>
    %79 = vector.extract_strided_slice %58 {offsets = [0, 256], sizes = [8, 128], strides = [1, 1]} : vector<8x384xf32> to vector<8x128xf32>
    %80 = vector.extract_strided_slice %62 {offsets = [0, 256], sizes = [8, 128], strides = [1, 1]} : vector<8x384xf32> to vector<8x128xf32>
    %81 = vector.broadcast %11 : vector<1x128xf32> to vector<8x128xf32>
    %82 = arith.addf %80, %81 : vector<8x128xf32>
    %83 = arith.mulf %70, %82 : vector<8x128xf32>
    %84 = arith.addf %79, %83 : vector<8x128xf32>
    %85 = math.tanh %84 : vector<8x128xf32>
    %86 = arith.subf %54, %85 : vector<8x128xf32>
    %87 = arith.mulf %78, %86 : vector<8x128xf32>
    %88 = arith.addf %85, %87 : vector<8x128xf32>
    %89 = vector.broadcast %60 : vector<8x1xf32> to vector<8x128xf32>
    %90 = arith.mulf %89, %88 : vector<8x128xf32>
    %91 = arith.index_cast %56 : i32 to index
    %c0_27 = arith.constant 0 : index
    %92 = vector.load %arg8[%91, %c0_27] : memref<32x128xf32, #tpu.memory_space<vmem>>, vector<8x128xf32>
    tpu.vector_store %arg8[%91, %c0_27], %90 {strides = array<i32>} : memref<32x128xf32, #tpu.memory_space<vmem>>, vector<8x128xf32>,
    %93 = arith.subf %88, %54 : vector<8x128xf32>
    %94 = vector.broadcast %60 : vector<8x1xf32> to vector<8x128xf32>
    %95 = arith.mulf %94, %93 : vector<8x128xf32>
    %96 = arith.addf %54, %95 : vector<8x128xf32>
    %c2_i32 = arith.constant 2 : i32
    %c8_i32_28 = arith.constant 8 : i32
    %97 = arith.muli %c2_i32, %c8_i32_28 : i32
    %98 = tpu.assume_multiple %97, 8 : i32
    %99 = arith.index_cast %98 : i32 to index
    %c0_29 = arith.constant 0 : index
    %100 = vector.load %arg10[%99, %c0_29] : memref<32x384xf32, #tpu.memory_space<vmem>>, vector<8x384xf32>
    %101 = arith.index_cast %98 : i32 to index
    %c0_30 = arith.constant 0 : index
    %102 = vector.load %arg2[%101, %c0_30] : memref<32x1xf32, #tpu.memory_space<vmem>>, vector<8x1xf32>
    %103 = arith.truncf %96 : vector<8x128xf32> to vector<8x128xbf16>
    %cst_31 = arith.constant dense<0.000000e+00> : vector<8x384xf32>
    %104 = tpu.matmul %103, %10, %cst_31 {dimension_numbers = #tpu.dot_dimension_numbers<[1], [0], [0], [1], [0, 0, 1, 1], [], []>} : vector<8x128xbf16>, vector<128x384xbf16>, vector<8x384xf32> -> vector<8x384xf32>
    %105 = vector.extract_strided_slice %100 {offsets = [0, 0], sizes = [8, 128], strides = [1, 1]} : vector<8x384xf32> to vector<8x128xf32>
    %106 = vector.extract_strided_slice %104 {offsets = [0, 0], sizes = [8, 128], strides = [1, 1]} : vector<8x384xf32> to vector<8x128xf32>
    %107 = arith.addf %105, %106 : vector<8x128xf32>
    %108 = arith.negf %107 : vector<8x128xf32>
    %109 = math.exp %108 : vector<8x128xf32>
    %cst_32 = arith.constant 1.000000e+00 : f32
    %110 = vector.broadcast %cst_32 : f32 to vector<8x128xf32>
    %111 = arith.addf %110, %109 : vector<8x128xf32>
    %112 = arith.divf %110, %111 : vector<8x128xf32>
    %113 = vector.extract_strided_slice %100 {offsets = [0, 128], sizes = [8, 128], strides = [1, 1]} : vector<8x384xf32> to vector<8x128xf32>
    %114 = vector.extract_strided_slice %104 {offsets = [0, 128], sizes = [8, 128], strides = [1, 1]} : vector<8x384xf32> to vector<8x128xf32>
    %115 = arith.addf %113, %114 : vector<8x128xf32>
    %116 = arith.negf %115 : vector<8x128xf32>
    %117 = math.exp %116 : vector<8x128xf32>
    %cst_33 = arith.constant 1.000000e+00 : f32
    %118 = vector.broadcast %cst_33 : f32 to vector<8x128xf32>
    %119 = arith.addf %118, %117 : vector<8x128xf32>
    %120 = arith.divf %118, %119 : vector<8x128xf32>
    %121 = vector.extract_strided_slice %100 {offsets = [0, 256], sizes = [8, 128], strides = [1, 1]} : vector<8x384xf32> to vector<8x128xf32>
    %122 = vector.extract_strided_slice %104 {offsets = [0, 256], sizes = [8, 128], strides = [1, 1]} : vector<8x384xf32> to vector<8x128xf32>
    %123 = vector.broadcast %11 : vector<1x128xf32> to vector<8x128xf32>
    %124 = arith.addf %122, %123 : vector<8x128xf32>
    %125 = arith.mulf %112, %124 : vector<8x128xf32>
    %126 = arith.addf %121, %125 : vector<8x128xf32>
    %127 = math.tanh %126 : vector<8x128xf32>
    %128 = arith.subf %96, %127 : vector<8x128xf32>
    %129 = arith.mulf %120, %128 : vector<8x128xf32>
    %130 = arith.addf %127, %129 : vector<8x128xf32>
    %131 = vector.broadcast %102 : vector<8x1xf32> to vector<8x128xf32>
    %132 = arith.mulf %131, %130 : vector<8x128xf32>
    %133 = arith.index_cast %98 : i32 to index
    %c0_34 = arith.constant 0 : index
    %134 = vector.load %arg8[%133, %c0_34] : memref<32x128xf32, #tpu.memory_space<vmem>>, vector<8x128xf32>
    tpu.vector_store %arg8[%133, %c0_34], %132 {strides = array<i32>} : memref<32x128xf32, #tpu.memory_space<vmem>>, vector<8x128xf32>,
    %135 = arith.subf %130, %96 : vector<8x128xf32>
    %136 = vector.broadcast %102 : vector<8x1xf32> to vector<8x128xf32>
    %137 = arith.mulf %136, %135 : vector<8x128xf32>
    %138 = arith.addf %96, %137 : vector<8x128xf32>
    %c3_i32 = arith.constant 3 : i32
    %c8_i32_35 = arith.constant 8 : i32
    %139 = arith.muli %c3_i32, %c8_i32_35 : i32
    %140 = tpu.assume_multiple %139, 8 : i32
    %141 = arith.index_cast %140 : i32 to index
    %c0_36 = arith.constant 0 : index
    %142 = vector.load %arg10[%141, %c0_36] : memref<32x384xf32, #tpu.memory_space<vmem>>, vector<8x384xf32>
    %143 = arith.index_cast %140 : i32 to index
    %c0_37 = arith.constant 0 : index
    %144 = vector.load %arg2[%143, %c0_37] : memref<32x1xf32, #tpu.memory_space<vmem>>, vector<8x1xf32>
    %145 = arith.truncf %138 : vector<8x128xf32> to vector<8x128xbf16>
    %cst_38 = arith.constant dense<0.000000e+00> : vector<8x384xf32>
    %146 = tpu.matmul %145, %10, %cst_38 {dimension_numbers = #tpu.dot_dimension_numbers<[1], [0], [0], [1], [0, 0, 1, 1], [], []>} : vector<8x128xbf16>, vector<128x384xbf16>, vector<8x384xf32> -> vector<8x384xf32>
    %147 = vector.extract_strided_slice %142 {offsets = [0, 0], sizes = [8, 128], strides = [1, 1]} : vector<8x384xf32> to vector<8x128xf32>
    %148 = vector.extract_strided_slice %146 {offsets = [0, 0], sizes = [8, 128], strides = [1, 1]} : vector<8x384xf32> to vector<8x128xf32>
    %149 = arith.addf %147, %148 : vector<8x128xf32>
    %150 = arith.negf %149 : vector<8x128xf32>
    %151 = math.exp %150 : vector<8x128xf32>
    %cst_39 = arith.constant 1.000000e+00 : f32
    %152 = vector.broadcast %cst_39 : f32 to vector<8x128xf32>
    %153 = arith.addf %152, %151 : vector<8x128xf32>
    %154 = arith.divf %152, %153 : vector<8x128xf32>
    %155 = vector.extract_strided_slice %142 {offsets = [0, 128], sizes = [8, 128], strides = [1, 1]} : vector<8x384xf32> to vector<8x128xf32>
    %156 = vector.extract_strided_slice %146 {offsets = [0, 128], sizes = [8, 128], strides = [1, 1]} : vector<8x384xf32> to vector<8x128xf32>
    %157 = arith.addf %155, %156 : vector<8x128xf32>
    %158 = arith.negf %157 : vector<8x128xf32>
    %159 = math.exp %158 : vector<8x128xf32>
    %cst_40 = arith.constant 1.000000e+00 : f32
    %160 = vector.broadcast %cst_40 : f32 to vector<8x128xf32>
    %161 = arith.addf %160, %159 : vector<8x128xf32>
    %162 = arith.divf %160, %161 : vector<8x128xf32>
    %163 = vector.extract_strided_slice %142 {offsets = [0, 256], sizes = [8, 128], strides = [1, 1]} : vector<8x384xf32> to vector<8x128xf32>
    %164 = vector.extract_strided_slice %146 {offsets = [0, 256], sizes = [8, 128], strides = [1, 1]} : vector<8x384xf32> to vector<8x128xf32>
    %165 = vector.broadcast %11 : vector<1x128xf32> to vector<8x128xf32>
    %166 = arith.addf %164, %165 : vector<8x128xf32>
    %167 = arith.mulf %154, %166 : vector<8x128xf32>
    %168 = arith.addf %163, %167 : vector<8x128xf32>
    %169 = math.tanh %168 : vector<8x128xf32>
    %170 = arith.subf %138, %169 : vector<8x128xf32>
    %171 = arith.mulf %162, %170 : vector<8x128xf32>
    %172 = arith.addf %169, %171 : vector<8x128xf32>
    %173 = vector.broadcast %144 : vector<8x1xf32> to vector<8x128xf32>
    %174 = arith.mulf %173, %172 : vector<8x128xf32>
    %175 = arith.index_cast %140 : i32 to index
    %c0_41 = arith.constant 0 : index
    %176 = vector.load %arg8[%175, %c0_41] : memref<32x128xf32, #tpu.memory_space<vmem>>, vector<8x128xf32>
    tpu.vector_store %arg8[%175, %c0_41], %174 {strides = array<i32>} : memref<32x128xf32, #tpu.memory_space<vmem>>, vector<8x128xf32>,
    %177 = arith.subf %172, %138 : vector<8x128xf32>
    %178 = vector.broadcast %144 : vector<8x1xf32> to vector<8x128xf32>
    %179 = arith.mulf %178, %177 : vector<8x128xf32>
    %180 = arith.addf %138, %179 : vector<8x128xf32>
    %c4_i32 = arith.constant 4 : i32
    %c0_42 = arith.constant 0 : index
    %c0_43 = arith.constant 0 : index
    %181 = vector.load %arg11[%c0_42, %c0_43] : memref<8x128xf32, #tpu.memory_space<vmem>>, vector<8x128xf32>
    tpu.vector_store %arg11[%c0_42, %c0_43], %180 {strides = array<i32>} : memref<8x128xf32, #tpu.memory_space<vmem>>, vector<8x128xf32>,
    %c1_i32_44 = arith.constant 1 : i32
    %182 = arith.cmpi eq, %arg0, %c1_i32_44 : i32
    %183 = arith.extui %182 : i1 to i32
    %c0_i32_45 = arith.constant 0 : i32
    %184 = arith.cmpi ne, %183, %c0_i32_45 : i32
    scf.if %184 {
      %c0_46 = arith.constant 0 : index
      %c0_47 = arith.constant 0 : index
      %185 = vector.load %arg9[%c0_46, %c0_47] : memref<8x128xf32, #tpu.memory_space<vmem>>, vector<8x128xf32>
      tpu.vector_store %arg9[%c0_46, %c0_47], %180 {strides = array<i32>} : memref<8x128xf32, #tpu.memory_space<vmem>>, vector<8x128xf32>,
    } else {
    }
    return
  }
  func.func @transform_0(%arg0: i32) -> (i32, i32) {
    %c0_i32 = arith.constant 0 : i32
    %c0_i32_0 = arith.constant 0 : i32
    return %arg0, %c0_i32 : i32, i32
  }
  func.func @transform_1(%arg0: i32) -> (i32, i32) {
    %c0_i32 = arith.constant 0 : i32
    %c0_i32_0 = arith.constant 0 : i32
    return %arg0, %c0_i32 : i32, i32
  }
  func.func @transform_2(%arg0: i32) -> (i32, i32) {
    %c0_i32 = arith.constant 0 : i32
    %c0_i32_0 = arith.constant 0 : i32
    %c0_i32_1 = arith.constant 0 : i32
    return %c0_i32, %c0_i32_0 : i32, i32
  }
  func.func @transform_3(%arg0: i32) -> (i32, i32) {
    %c0_i32 = arith.constant 0 : i32
    %c0_i32_0 = arith.constant 0 : i32
    %c0_i32_1 = arith.constant 0 : i32
    return %c0_i32, %c0_i32_0 : i32, i32
  }
  func.func @transform_4(%arg0: i32) -> (i32, i32) {
    %c0_i32 = arith.constant 0 : i32
    %c0_i32_0 = arith.constant 0 : i32
    %c0_i32_1 = arith.constant 0 : i32
    return %c0_i32, %c0_i32_0 : i32, i32
  }
  func.func @transform_5(%arg0: i32) -> (i32, i32) {
    %c0_i32 = arith.constant 0 : i32
    %c0_i32_0 = arith.constant 0 : i32
    %c0_i32_1 = arith.constant 0 : i32
    return %c0_i32, %c0_i32_0 : i32, i32
  }
  func.func @transform_6(%arg0: i32) -> (i32, i32) {
    %c0_i32 = arith.constant 0 : i32
    %c0_i32_0 = arith.constant 0 : i32
    %c0_i32_1 = arith.constant 0 : i32
    return %c0_i32, %c0_i32_0 : i32, i32
  }
  func.func @transform_7(%arg0: i32) -> (i32, i32) {
    %c0_i32 = arith.constant 0 : i32
    %c0_i32_0 = arith.constant 0 : i32
    return %arg0, %c0_i32 : i32, i32
  }
  func.func @transform_8(%arg0: i32) -> (i32, i32) {
    %c0_i32 = arith.constant 0 : i32
    %c0_i32_0 = arith.constant 0 : i32
    %c0_i32_1 = arith.constant 0 : i32
    return %c0_i32, %c0_i32_0 : i32, i32
  }
}

</mosaic_0001>

<bundles_post_ra>
// kernel: _lambda_.1
= control target key start
LH: loop header
LB: loop body
LE: loop exit
PB: predicated region body
PF: predicated region fallthrough
CT: control target
= control target key end

     0   :  { %s1781_s27 = smov 0   ;;  %s2224_s0 = inlined_call_operand.vmem [shape: bf16[64,128], index: 0, kind: input, shape index: {}]   ;;  %s2225_s1 = inlined_call_operand.vmem [shape: f32[64,1], index: 1, kind: input, shape index: {}]   ;;  %s2226_s2 = inlined_call_operand.vmem [shape: f32[8,128], index: 2, kind: input, shape index: {}]   ;;  %s2227_s3 = inlined_call_operand.vmem [shape: bf16[128,384], index: 3, kind: input, shape index: {}]   ;;  %s2228_s4 = inlined_call_operand.vmem [shape: bf16[128,384], index: 4, kind: input, shape index: {}]   ;;  %s2229_s5 = inlined_call_operand.vmem [shape: f32[1,384], index: 5, kind: input, shape index: {}]   ;;  %s2230_s6 = inlined_call_operand.vmem [shape: f32[1,128], index: 6, kind: input, shape index: {}]   ;;  %s2231_s7 = inlined_call_operand.vmem [shape: f32[64,128], index: 7, kind: output, shape index: {0}]   ;;  %s2232_s8 = inlined_call_operand.vmem [shape: f32[8,128], index: 8, kind: output, shape index: {1}]  }
   0x1 LB: > { %s1787_s28 = sadd.s32 4294967295, %s1731_s27   ;;  %p1384_p0 = scmp.ge.s32.totalorder %s1731_s27, 1  ;;  %s1731_s27 = sphi %s1781_s27, %s19_s27  }
   0x2   : > { %p272_p1 = scmp.lt.s32.totalorder %s1731_s27, 3 }
   0x4   : > { %p273_p2 = pnand %p1384_p0, %p272_p1 }
   0x5   : > { %s1385_s29 = sshll.u32 (!%p273_p2), %s1787_s28, 2  ;;  %p1391_p4 = scmp.ne.s32.totalorder (!%p273_p2), %s1787_s28, 0 }
   0x6   : > { %276 = sbr.rel (%p273_p2) target bundleno = 1161 (0x489), region = 48  ;;  %p312_p3 = scmp.lt.s32.totalorder (!%p273_p2), %s1385_s29, 7 }
   0xd   : > { %s2234_s29 = smov (!%p312_p3, %s1385_s29), 7  ;;  %333 = sbr.rel (%p1391_p4) target bundleno = 20 (0x14), region = 52 }
   0xe   : > { %s1386_s30 = sshll.u32 %s2234_s29, 2  ;;  %s1388_s9 = sshll.u32 %s2234_s29, 3  ;;  %v334_v0 = vld [vmem:[%s2226_s2] sm:$0xff] (!%p1391_p4) }
   0xf   : > { %s1795_s12 = scalar_lea.vmem %s2224_s0, %s1386_s30  ;;  %s1800_s15 = scalar_lea.vmem %s2225_s1, %s1388_s9  ;;  %335 = vst [vmem:[#allocation3] sm:$0xff] (!%p1391_p4), %v334_v0 }
  0x10   : > { %s1805_s18 = scalar_lea.vmem %s2231_s7, %s1388_s9 }
  0x14 PF: > { %v1619_v1 = vld [vmem:[%s2227_s3 + $0x4] ss:$12 sps:$4 sm:$0xff]   ;;  %v1621_v2 = vld [vmem:[%s2227_s3] ss:$12 sps:$4 sm:$0xff]   ;;  %v1733_v3 = vmov 0   ;;  %v1734_v37 = vmov 0.0   ;;  %v374_v57 = vlaneseq }
  0x15   : > { %561 = vmatprep.mubr.bf16.mxu0 %v1733_v3  ;;  %1617 = vset.pattern.permute.xlu0 %v1733_v3  ;;  %v1622_v4 = vld [vmem:[%s2227_s3 + $0x1c] ss:$12 sps:$4 sm:$0xff]   ;;  %v1624_v5 = vld [vmem:[%s2227_s3 + $0x18] ss:$12 sps:$4 sm:$0xff]   ;;  %v1625_v6 = vld [vmem:[%s2227_s3 + $0x34] ss:$12 sps:$4 sm:$0xff]  }
  0x16   : > { %529 = vmatprep.subr.bf16.mxu0 %v1619_v1  ;;  %1618 = vset.pattern.permute.xlu1 %v1733_v3  ;;  %v1627_v7 = vld [vmem:[%s2227_s3 + $0x30] ss:$12 sps:$4 sm:$0xff]   ;;  %v1628_v8 = vld [vmem:[%s2227_s3 + $0x4c] ss:$12 sps:$4 sm:$0xff]   ;;  %v1637_v9 = vld [vmem:[%s2227_s3 + $0x8] ss:$12 sps:$4 sm:$0xff]  }
  0x17   : > { %530 = vmatpush1.bf16.msra.mxu0 %v1621_v2  ;;  %v1630_v10 = vld [vmem:[%s2227_s3 + $0x48] ss:$12 sps:$4 sm:$0xff]   ;;  %1506 = vmatprep.subr.bf16.mxu1 %v1637_v9  ;;  %v1641_v11 = vld [vmem:[%s2227_s3 + $0x20] ss:$12 sps:$4 sm:$0xff]   ;;  %v1631_v12 = vld [vmem:[%s2227_s3 + $0x64] ss:$12 sps:$4 sm:$0xff]  }
  0x18   : > { %531 = vmatprep.subr.bf16.mxu0 %v1622_v4  ;;  %1507 = vmatpush3.bf16.msra.mxu1 %v1637_v9  ;;  %v1645_v13 = vld [vmem:[%s2227_s3 + $0x38] ss:$12 sps:$4 sm:$0xff]   ;;  %v1633_v14 = vld [vmem:[%s2227_s3 + $0x60] ss:$12 sps:$4 sm:$0xff]   ;;  %v1634_v15 = vld [vmem:[%s2227_s3 + $0x7c] ss:$12 sps:$4 sm:$0xff]  }
  0x19   : > { %1508 = vmatprep.subr.bf16.mxu1 %v1641_v11  ;;  %v1646_v16 = vld [vmem:[%s1795_s12] sm:$0xff]   ;;  %v1650_v17 = vld [vmem:[%s2227_s3 + $0x50] ss:$12 sps:$4 sm:$0xff]   ;;  %v1654_v20 = vld [vmem:[%s2227_s3 + $0x68] ss:$12 sps:$4 sm:$0xff]   ;;  %vm1735_vm0 = vmmov 0  }
  0x1a   : > { %1522 = vmatprep.mubr.bf16.mxu1 %v1646_v16  ;;  %v1636_v18 = vld [vmem:[%s2227_s3 + $0x78] ss:$12 sps:$4 sm:$0xff]   ;;  %v1638_v19 = vld [vmem:[%s2227_s3 + $0x94] ss:$12 sps:$4 sm:$0xff]   ;;  %v1640_v21 = vld [vmem:[%s2227_s3 + $0x90] ss:$12 sps:$4 sm:$0xff]  }
  0x1b   : > { %532 = vmatpush1.bf16.msra.mxu0 %v1624_v5  ;;  %v1642_v22 = vld [vmem:[%s2227_s3 + $0xac] ss:$12 sps:$4 sm:$0xff]   ;;  %v1644_v24 = vld [vmem:[%s2227_s3 + $0xa8] ss:$12 sps:$4 sm:$0xff]   ;;  %v1884_v25 = vld [vmem:[%s2228_s4 + $0x4] ss:$12 sps:$4 sm:$0xff]  }
  0x1c   : > { %533 = vmatprep.subr.bf16.mxu0 %v1625_v6  ;;  %1509 = vmatpush3.bf16.msra.mxu1 %v1641_v11  ;;  %v1658_v23 = vld [vmem:[%s2227_s3 + $0x80] ss:$12 sps:$4 sm:$0xff]   ;;  %v1662_v26 = vld [vmem:[%s2227_s3 + $0x98] ss:$12 sps:$4 sm:$0xff]   ;;  %v1897_v28 = vld [vmem:[%s2228_s4 + $0x1c] ss:$12 sps:$4 sm:$0xff]  }
  0x1d   : > { %1510 = vmatprep.subr.bf16.mxu1 %v1645_v13  ;;  %v1892_v27 = vld [vmem:[%s2228_s4] ss:$12 sps:$4 sm:$0xff]   ;;  %v1666_v29 = vld [vmem:[%s2227_s3 + $0xb0] ss:$12 sps:$4 sm:$0xff]   ;;  %v1907_v30 = vld [vmem:[%s2228_s4 + $0x18] ss:$12 sps:$4 sm:$0xff]  }
  0x1e   : > { %v1913_v31 = vld [vmem:[%s2228_s4 + $0x34] ss:$12 sps:$4 sm:$0xff]   ;;  %v1918_v32 = vld [vmem:[%s2228_s4 + $0x30] ss:$12 sps:$4 sm:$0xff]   ;;  %v1669_v33 = vld [vmem:[%s1795_s12 + $0x8] sm:$0xff]   ;;  %v375_v58 = vshrl.u32 %v374_v57, 7 }
  0x1f   : > { %534 = vmatpush1.bf16.msra.mxu0 %v1627_v7  ;;  %v1926_v34 = vld [vmem:[%s2228_s4 + $0x8] ss:$12 sps:$4 sm:$0xff]   ;;  %v683_v35 = vld [vmem:[%s1800_s15] sm:$0xff]  ;;  %v1933_v36 = vld [vmem:[%s2228_s4 + $0x4c] ss:$12 sps:$4 sm:$0xff]   ;;  %p1457_p5 = scmp.ne.s32.totalorder %s1787_s28, 1 }
  0x20   : > { %535 = vmatprep.subr.bf16.mxu0 %v1628_v8  ;;  %1511 = vmatpush3.bf16.msra.mxu1 %v1645_v13  ;;  %v1940_v38 = vld [vmem:[%s2228_s4 + $0x48] ss:$12 sps:$4 sm:$0xff]   ;;  %v1946_v39 = vld [vmem:[%s2228_s4 + $0x20] ss:$12 sps:$4 sm:$0xff]   ;;  %v1953_v41 = vld [vmem:[%s2228_s4 + $0x64] ss:$12 sps:$4 sm:$0xff]  }
  0x21   : > { %1512 = vmatprep.subr.bf16.mxu1 %v1650_v17  ;;  %923 = vperm.xlu0 %1617, %v683_v35   ;;  %v1445_v40 = vld [vmem:[%s1800_s15 + $0x8] sm:$0xff]  ;;  %v1969_v43 = vld [vmem:[%s2228_s4 + $0x38] ss:$12 sps:$4 sm:$0xff]   ;;  %v1988_v46 = vld [vmem:[%s2228_s4 + $0x50] ss:$12 sps:$4 sm:$0xff]   ;;  %v376_v59 = vsub.s32 0, %v375_v58 }
  0x22   : > { %v1963_v42 = vld [vmem:[%s2228_s4 + $0x60] ss:$12 sps:$4 sm:$0xff]   ;;  %v1975_v44 = vld [vmem:[%s2228_s4 + $0x7c] ss:$12 sps:$4 sm:$0xff]   ;;  %v1982_v45 = vld [vmem:[%s2228_s4 + $0x78] ss:$12 sps:$4 sm:$0xff]  }
  0x23   : > { %536 = vmatpush1.bf16.msra.mxu0 %v1630_v10  ;;  %v1994_v47 = vld [vmem:[%s2228_s4 + $0x94] ss:$12 sps:$4 sm:$0xff]   ;;  %v2001_v48 = vld [vmem:[%s2228_s4 + $0x90] ss:$12 sps:$4 sm:$0xff]   ;;  %v2013_v50 = vld [vmem:[%s2228_s4 + $0xac] ss:$12 sps:$4 sm:$0xff]  }
  0x24   : > { %537 = vmatprep.subr.bf16.mxu0 %v1631_v12  ;;  %1513 = vmatpush3.bf16.msra.mxu1 %v1650_v17  ;;  %v2007_v49 = vld [vmem:[%s2228_s4 + $0x68] ss:$12 sps:$4 sm:$0xff]   ;;  %v2022_v52 = vld [vmem:[#allocation3] sm:$0xff]  ;;  %v2047_v56 = vld [vmem:[%s2228_s4 + $0xb0] ss:$12 sps:$4 sm:$0xff]   ;;  %v380_v61 = vsub.s32 1, %v375_v58 }
  0x25   : > { %1514 = vmatprep.subr.bf16.mxu1 %v1654_v20  ;;  %1044 = vperm.xlu0 %1617, %v1445_v40   ;;  %v2020_v51 = vld [vmem:[%s2228_s4 + $0xa8] ss:$12 sps:$4 sm:$0xff]   ;;  %v2028_v53 = vld [vmem:[%s2228_s4 + $0x80] ss:$12 sps:$4 sm:$0xff]   ;;  %v684_v54 = vpack.c.bf16 %v2022_v52, %v2022_v52  ;;  %v2039_v55 = vld [vmem:[%s2228_s4 + $0x98] ss:$12 sps:$4 sm:$0xff]  }
  0x26   : > { %v372_v60 = vld [vmem:[%s2229_s5] sm:$0x7]  ;;  %v384_v1 = vsub.s32 2, %v375_v58 }
  0x27   : > { %538 = vmatpush1.bf16.msra.mxu0 %v1633_v14  ;;  %v377_v62 = vrot.slane %v372_v60, %v376_v59  ;;  %v381_v2 = vrot.slane %v372_v60, %v380_v61 }
  0x28   : > { %539 = vmatprep.subr.bf16.mxu0 %v1634_v15  ;;  %1515 = vmatpush3.bf16.msra.mxu1 %v1654_v20  ;;  %v385_v8 = vrot.slane %v372_v60, %v384_v1 }
  0x29   : > { %1516 = vmatprep.subr.bf16.mxu1 %v1658_v23 }
  0x2b   : > { %540 = vmatpush1.bf16.msra.mxu0 %v1636_v18 }
  0x2c   : > { %541 = vmatprep.subr.bf16.mxu0 %v1638_v19  ;;  %1517 = vmatpush3.bf16.msra.mxu1 %v1658_v23 }
  0x2d   : > { %1518 = vmatprep.subr.bf16.mxu1 %v1662_v26 }
  0x2f   : > { %542 = vmatpush1.bf16.msra.mxu0 %v1640_v21 }
  0x30   : > { %543 = vmatprep.subr.bf16.mxu0 %v1642_v22  ;;  %1519 = vmatpush3.bf16.msra.mxu1 %v1662_v26 }
  0x31   : > { %1520 = vmatprep.subr.bf16.mxu1 %v1666_v29 }
  0x33   : > { %544 = vmatpush1.bf16.msra.mxu0 %v1644_v24 }
  0x34   : > { %813 = vmatprep.subr.bf16.mxu0 %v1884_v25  ;;  %1521 = vmatpush3.bf16.msra.mxu1 %v1666_v29 }
  0x35   : > { %1526 = vmatprep.subr.bf16.mxu1 %v1734_v37 }
  0x36   : > { %562 = vmatmul.mubr.bf16.vlgmr.msra.gmra.mrb[0].mxu0 %v1646_v16 }
  0x37   : > { %814 = vmatpush1.bf16.msra.mxu0 %v1892_v27  ;;  %571 = vmatprep.mubr.bf16.mxu0 %v1733_v3 }
  0x38   : > { %815 = vmatprep.subr.bf16.mxu0 %v1897_v28  ;;  %1523 = vmatmul.mubr.bf16.vlgmr.msra.gmra.mrb[0].mxu1 %v1669_v33 }
  0x39   : > { %1527 = vmatpush3.bf16.msra.mxu1 %v1926_v34  ;;  %1542 = vmatprep.mubr.msk.bf16.mxu1 %vm1735_vm0, %v1734_v37 }
  0x3a   : > { %1528 = vmatprep.subr.bf16.mxu1 %v1734_v37 }
  0x3b   : > { %816 = vmatpush1.bf16.msra.mxu0 %v1907_v30 }
  0x3c   : > { %817 = vmatprep.subr.bf16.mxu0 %v1913_v31 }
  0x3d   : > { %1529 = vmatpush3.bf16.msra.mxu1 %v1946_v39 }
  0x3e   : > { %572 = vmatmul.mubr.bf16.gmra.mrb[4].mxu0 %v1669_v33  ;;  %1530 = vmatprep.subr.bf16.mxu1 %v1734_v37 }
  0x3f   : > { %818 = vmatpush1.bf16.msra.mxu0 %v1918_v32  ;;  %845 = vmatprep.mubr.bf16.mxu0 %v1733_v3 }
  0x40   : > { %819 = vmatprep.subr.bf16.mxu0 %v1933_v36 }
  0x41   : > { %1531 = vmatpush3.bf16.msra.mxu1 %v1969_v43 }
  0x42   : > { %1532 = vmatprep.subr.bf16.mxu1 %v1734_v37 }
  0x43   : > { %820 = vmatpush1.bf16.msra.mxu0 %v1940_v38 }
  0x44   : > { %821 = vmatprep.subr.bf16.mxu0 %v1953_v41 }
  0x45   : > { %1533 = vmatpush3.bf16.msra.mxu1 %v1988_v46 }
  0x46   : > { %1534 = vmatprep.subr.bf16.mxu1 %v1734_v37 }
  0x47   : > { %822 = vmatpush1.bf16.msra.mxu0 %v1963_v42 }
  0x48   : > { %823 = vmatprep.subr.bf16.mxu0 %v1975_v44 }
  0x49   : > { %1535 = vmatpush3.bf16.msra.mxu1 %v2007_v49 }
  0x4a   : > { %1536 = vmatprep.subr.bf16.mxu1 %v1734_v37 }
  0x4b   : > { %824 = vmatpush1.bf16.msra.mxu0 %v1982_v45 }
  0x4c   : > { %825 = vmatprep.subr.bf16.mxu0 %v1994_v47 }
  0x4d   : > { %1537 = vmatpush3.bf16.msra.mxu1 %v2028_v53 }
  0x4e   : > { %1538 = vmatprep.subr.bf16.mxu1 %v1734_v37 }
  0x4f   : > { %826 = vmatpush1.bf16.msra.mxu0 %v2001_v48 }
  0x50   : > { %827 = vmatprep.subr.bf16.mxu0 %v2013_v50 }
  0x51   : > { %1539 = vmatpush3.bf16.msra.mxu1 %v2039_v55 }
  0x52   : > { %1540 = vmatprep.subr.bf16.mxu1 %v1734_v37 }
  0x53   : > { %828 = vmatpush1.bf16.msra.mxu0 %v2020_v51 }
  0x54   : > { %940 = vmatprep.subr.bf16.mxu0 %v1884_v25 }
  0x55   : > { %1541 = vmatpush3.bf16.msra.mxu1 %v2047_v56 }
  0x56   : > { %846 = vmatmul.mubr.bf16.vlgmr.msra.gmra.mrb[8].mxu0 %v684_v54  ;;  %1546 = vmatprep.subr.bf16.mxu1 %v1734_v37 }
  0x57   : > { %941 = vmatpush1.bf16.msra.mxu0 %v1892_v27  ;;  %972 = vmatprep.mubr.bf16.mxu0 %v1733_v3 }
  0x58   : > { %942 = vmatprep.subr.bf16.mxu0 %v1897_v28  ;;  %1543 = vmatmul.mubr.bf16.vlgmr.msra.gmra.mrb[4].mxu1 %v684_v54 }
  0x59   : > { %1547 = vmatpush3.bf16.msra.mxu1 %v1926_v34  ;;  %1562 = vmatprep.mubr.msk.bf16.mxu1 %vm1735_vm0, %v1734_v37 }
  0x5a   : > { %1548 = vmatprep.subr.bf16.mxu1 %v1734_v37 }
  0x5b   : > { %943 = vmatpush1.bf16.msra.mxu0 %v1907_v30 }
  0x5c   : > { %944 = vmatprep.subr.bf16.mxu0 %v1913_v31 }
  0x5d   : > { %1549 = vmatpush3.bf16.msra.mxu1 %v1946_v39 }
  0x5e   : > { %1550 = vmatprep.subr.bf16.mxu1 %v1734_v37 }
  0x5f   : > { %945 = vmatpush1.bf16.msra.mxu0 %v1918_v32 }
  0x60   : > { %946 = vmatprep.subr.bf16.mxu0 %v1933_v36 }
  0x61   : > { %1551 = vmatpush3.bf16.msra.mxu1 %v1969_v43 }
  0x62   : > { %1552 = vmatprep.subr.bf16.mxu1 %v1734_v37 }
  0x63   : > { %947 = vmatpush1.bf16.msra.mxu0 %v1940_v38 }
  0x64   : > { %948 = vmatprep.subr.bf16.mxu0 %v1953_v41 }
  0x65   : > { %1553 = vmatpush3.bf16.msra.mxu1 %v1988_v46 }
  0x66   : > { %1554 = vmatprep.subr.bf16.mxu1 %v1734_v37 }
  0x67   : > { %949 = vmatpush1.bf16.msra.mxu0 %v1963_v42 }
  0x68   : > { %950 = vmatprep.subr.bf16.mxu0 %v1975_v44 }
  0x69   : > { %1555 = vmatpush3.bf16.msra.mxu1 %v2007_v49 }
  0x6a   : > { %1556 = vmatprep.subr.bf16.mxu1 %v1734_v37 }
  0x6b   : > { %951 = vmatpush1.bf16.msra.mxu0 %v1982_v45 }
  0x6c   : > { %952 = vmatprep.subr.bf16.mxu0 %v1994_v47 }
  0x6d   : > { %1557 = vmatpush3.bf16.msra.mxu1 %v2028_v53 }
  0x6e   : > { %1558 = vmatprep.subr.bf16.mxu1 %v1734_v37 }
  0x6f   : > { %953 = vmatpush1.bf16.msra.mxu0 %v2001_v48 }
  0x70   : > { %954 = vmatprep.subr.bf16.mxu0 %v2013_v50 }
  0x71   : > { %1559 = vmatpush3.bf16.msra.mxu1 %v2039_v55 }
  0x72   : > { %1560 = vmatprep.subr.bf16.mxu1 %v1734_v37 }
  0x73   : > { %955 = vmatpush1.bf16.msra.mxu0 %v2020_v51 }
  0x74   : > { %1062 = vmatprep.subr.bf16.mxu0 %v1884_v25 }
  0x75   : > { %1561 = vmatpush3.bf16.msra.mxu1 %v2047_v56 }
  0x76   : > { %1566 = vmatprep.subr.bf16.mxu1 %v1734_v37 }
 0x109   : > { %v563_v63 = vpop.f32.mrb[0].mxu0 }
 0x10a   : > { %v565_v0 = vpop.f32.mrb[1].mxu0  ;;  %v564_v24 = vadd.f32 %v563_v63, %v377_v62 }
 0x10b   : > { %v567_v4 = vpop.f32.mrb[2].mxu0  ;;  %v1524_v10 = vpop.f32.mrb[0].mxu1  ;;  %v566_v26 = vadd.f32 %v565_v0, %v381_v2 }
 0x10c   : > { %v2090_v5 = vadd.f32 %v567_v4, %v377_v62  ;;  %v569_v6 = vpop.f32.mrb[3].mxu0  ;;  %v2096_v13 = vadd.f32 %v1524_v10, %v385_v8  ;;  %v616_v14 = vpop.f32.mrb[1].mxu1 }
 0x10d   : > { %v2092_v7 = vadd.f32 %v569_v6, %v381_v2  ;;  %v1525_v17 = vpop.f32.mrb[2].mxu1  ;;  %v617_v10 = vadd.f32 %v616_v14, %v385_v8  ;;  %v1453_v14 = vld [vmem:[%s1800_s15 + $0x18] sm:$0xff] }
 0x10e   : > { %v2102_v20 = vadd.f32 %v1525_v17, %v385_v8  ;;  %v619_v21 = vpop.f32.mrb[3].mxu1 }
 0x10f   : > { %v2106_v23 = vadd.f32 %v619_v21, %v385_v8 }
 0x111   : > { %v573_v9 = vpop.f32.mrb[4].mxu0 }
 0x112   : > { %v2094_v11 = vadd.f32 %v573_v9, %v377_v62  ;;  %v575_v12 = vpop.f32.mrb[5].mxu0 }
 0x113   : > { %v2098_v15 = vadd.f32 %v575_v12, %v381_v2  ;;  %v577_v16 = vpop.f32.mrb[6].mxu0 }
 0x114   : > { %v2100_v18 = vadd.f32 %v577_v16, %v377_v62  ;;  %v579_v19 = vpop.f32.mrb[7].mxu0  ;;  %v2111_v62 = vld [vmem:[%s2230_s6] ss:$0 sm:$0xff] }
 0x115   : > { %v2104_v22 = vadd.f32 %v579_v19, %v381_v2 }
 0x129   : > { %v847_v29 = vpop.f32.mrb[8].mxu0 }
 0x12a   : > { %v894_v33 = vadd.f32 %v847_v29, %v564_v24  ;;  %v849_v35 = vpop.f32.mrb[9].mxu0 }
 0x12b   : > { %v901_v40 = vadd.f32 %v849_v35, %v566_v26  ;;  %v851_v54 = vpop.f32.mrb[10].mxu0  ;;  %v888_v59 = vpop.f32.mrb[4].mxu1 }
 0x12c   : > { %v1442_v57 = vmul.f32 -1.442695, %v894_v33  ;;  %v852_v58 = vpop.f32.mrb[11].mxu0  ;;  %v1544_v60 = vpop.f32.mrb[5].mxu1  ;;  %v914_v63 = vadd.f32 %v2111_v62, %v888_v59 }
 0x12d   : > { %v891_v61 = vpop.f32.mrb[6].mxu1  ;;  %v1443_v4 = vmul.f32 -1.442695, %v901_v40  ;;  %v924_v33 = vpop.permute.xlu0 %923 }
 0x12e   : > { %1685 = vpow2.f32 %v1442_v57  ;;  %v1545_v1 = vpop.f32.mrb[7].mxu1 }
 0x12f   : > { %1687 = vpow2.f32 %v1443_v4 }
 0x138   : > { %v1686_v6 = vpop.eup %1685 }
 0x139   : > { %v898_v9 = vadd.f32 1.0, %v1686_v6  ;;  %v1688_v0 = vpop.eup %1687 }
 0x13a   : > { %v905_v16 = vadd.f32 1.0, %v1688_v0 }
 0x13b   : > { %1689 = vrcp.f32 %v898_v9 }
 0x145   : > { %v1690_v2 = vpop.eup %1689 }
 0x146   : > { %v915_v12 = vmul.f32 %v1690_v2, %v914_v63 }
 0x148   : > { %v916_v17 = vadd.f32 %v915_v12, %v617_v10 }
 0x14a   : > { %1691 = vtanh.f32 %v916_v17 }
 0x14b   : > { %1693 = vrcp.f32 %v905_v16 }
 0x154   : > { %v1692_v19 = vpop.eup %1691 }
 0x155   : > { %v918_v21 = vsub.f32 %v2022_v52, %v1692_v19  ;;  %v1694_v24 = vpop.eup %1693 }
 0x157   : > { %v919_v26 = vmul.f32 %v1694_v24, %v918_v21 }
 0x159   : > { %v920_v29 = vadd.f32 %v1692_v19, %v919_v26 }
 0x15b   : > { %v926_v35 = vmul.f32 %v924_v33, %v920_v29  ;;  %v928_v40 = vsub.f32 %v920_v29, %v2022_v52 }
 0x15d   : > { %927 = vst [vmem:[%s1805_s18] sm:$0xff] %v926_v35  ;;  %v929_v54 = vmul.f32 %v928_v40, %v924_v33  ;;  %v1045_v40 = vpop.permute.xlu0 %1044 }
 0x15f   : > { %v2118_v57 = vadd.f32 %v929_v54, %v2022_v52  ;;  %v1449_v52 = vld [vmem:[%s1800_s15 + $0x10] sm:$0xff] }
 0x160   : > { %1166 = vperm.xlu1 %1618, %v1449_v52  }
 0x161   : > { %v939_v8 = vpack.c.bf16 %v2118_v57, %v2118_v57 }
 0x163   : > { %973 = vmatmul.mubr.bf16.vlgmr.msra.gmra.mrb[12].mxu0 %v939_v8  ;;  %1563 = vmatmul.mubr.bf16.vlgmr.msra.gmra.mrb[8].mxu1 %v939_v8 }
 0x164   : > { %1063 = vmatpush1.bf16.msra.mxu0 %v1892_v27  ;;  %1567 = vmatpush3.bf16.msra.mxu1 %v1926_v34 }
 0x165   : > { %1064 = vmatprep.subr.bf16.mxu0 %v1897_v28  ;;  %1568 = vmatprep.subr.bf16.mxu1 %v1734_v37 }
 0x166   : > { %1094 = vmatprep.mubr.bf16.mxu0 %v1733_v3  ;;  %1582 = vmatprep.mubr.msk.bf16.mxu1 %vm1735_vm0, %v1734_v37 }
 0x167   : > { %1288 = vperm.xlu1 %1618, %v1453_v14  }
 0x168   : > { %1065 = vmatpush1.bf16.msra.mxu0 %v1907_v30  ;;  %1569 = vmatpush3.bf16.msra.mxu1 %v1946_v39 }
 0x169   : > { %1066 = vmatprep.subr.bf16.mxu0 %v1913_v31  ;;  %1570 = vmatprep.subr.bf16.mxu1 %v1734_v37 }
 0x16c   : > { %1067 = vmatpush1.bf16.msra.mxu0 %v1918_v32  ;;  %1571 = vmatpush3.bf16.msra.mxu1 %v1969_v43 }
 0x16d   : > { %1068 = vmatprep.subr.bf16.mxu0 %v1933_v36  ;;  %1572 = vmatprep.subr.bf16.mxu1 %v1734_v37 }
 0x170   : > { %1069 = vmatpush1.bf16.msra.mxu0 %v1940_v38  ;;  %1573 = vmatpush3.bf16.msra.mxu1 %v1988_v46 }
 0x171   : > { %1070 = vmatprep.subr.bf16.mxu0 %v1953_v41  ;;  %1574 = vmatprep.subr.bf16.mxu1 %v1734_v37 }
 0x174   : > { %1071 = vmatpush1.bf16.msra.mxu0 %v1963_v42  ;;  %1575 = vmatpush3.bf16.msra.mxu1 %v2007_v49 }
 0x175   : > { %1072 = vmatprep.subr.bf16.mxu0 %v1975_v44  ;;  %1576 = vmatprep.subr.bf16.mxu1 %v1734_v37 }
 0x178   : > { %1073 = vmatpush1.bf16.msra.mxu0 %v1982_v45  ;;  %1577 = vmatpush3.bf16.msra.mxu1 %v2028_v53 }
 0x179   : > { %1074 = vmatprep.subr.bf16.mxu0 %v1994_v47  ;;  %1578 = vmatprep.subr.bf16.mxu1 %v1734_v37 }
 0x17c   : > { %1075 = vmatpush1.bf16.msra.mxu0 %v2001_v48  ;;  %1579 = vmatpush3.bf16.msra.mxu1 %v2039_v55 }
 0x17d   : > { %1076 = vmatprep.subr.bf16.mxu0 %v2013_v50  ;;  %1580 = vmatprep.subr.bf16.mxu1 %v1734_v37 }
 0x180   : > { %1077 = vmatpush1.bf16.msra.mxu0 %v2020_v51  ;;  %1581 = vmatpush3.bf16.msra.mxu1 %v2047_v56 }
 0x181   : > { %1184 = vmatprep.subr.bf16.mxu0 %v1884_v25  ;;  %1586 = vmatprep.subr.bf16.mxu1 %v1734_v37 }
 0x236   : > { %v974_v58 = vpop.f32.mrb[12].mxu0  ;;  %v1015_v59 = vpop.f32.mrb[8].mxu1 }
 0x237   : > { %v1021_v60 = vadd.f32 %v974_v58, %v2090_v5  ;;  %v976_v61 = vpop.f32.mrb[13].mxu0  ;;  %v1564_v1 = vpop.f32.mrb[9].mxu1  ;;  %v1035_v17 = vadd.f32 %v2111_v62, %v1015_v59 }
 0x238   : > { %v1028_v4 = vadd.f32 %v976_v61, %v2092_v7  ;;  %v978_v6 = vpop.f32.mrb[14].mxu0  ;;  %v1018_v9 = vpop.f32.mrb[10].mxu1 }
 0x239   : > { %v1446_v63 = vmul.f32 -1.442695, %v1021_v60  ;;  %v979_v0 = vpop.f32.mrb[15].mxu0  ;;  %v1565_v2 = vpop.f32.mrb[11].mxu1 }
 0x23a   : > { %v1447_v25 = vmul.f32 -1.442695, %v1028_v4 }
 0x23b   : > { %1695 = vpow2.f32 %v1446_v63 }
 0x23c   : > { %1697 = vpow2.f32 %v1447_v25 }
 0x245   : > { %v1696_v10 = vpop.eup %1695 }
 0x246   : > { %v1025_v12 = vadd.f32 1.0, %v1696_v10  ;;  %v1698_v16 = vpop.eup %1697 }
 0x247   : > { %v1032_v7 = vadd.f32 1.0, %v1698_v16 }
 0x248   : > { %1699 = vrcp.f32 %v1025_v12 }
 0x252   : > { %v1700_v5 = vpop.eup %1699 }
 0x253   : > { %v1036_v19 = vmul.f32 %v1700_v5, %v1035_v17 }
 0x255   : > { %v1037_v21 = vadd.f32 %v1036_v19, %v2106_v23 }
 0x257   : > { %1701 = vtanh.f32 %v1037_v21 }
 0x258   : > { %1703 = vrcp.f32 %v1032_v7 }
 0x261   : > { %v1702_v24 = vpop.eup %1701 }
 0x262   : > { %v1039_v26 = vsub.f32 %v2118_v57, %v1702_v24  ;;  %v1704_v29 = vpop.eup %1703 }
 0x264   : > { %v1040_v33 = vmul.f32 %v1704_v29, %v1039_v26 }
 0x266   : > { %v1041_v35 = vadd.f32 %v1702_v24, %v1040_v33 }
 0x268   : > { %v1050_v54 = vsub.f32 %v1041_v35, %v2118_v57  ;;  %v1047_v8 = vmul.f32 %v1045_v40, %v1041_v35 }
 0x26a   : > { %v1051_v52 = vmul.f32 %v1050_v54, %v1045_v40  ;;  %1448 = vst [vmem:[%s1805_s18 + $0x8] sm:$0xff] %v1047_v8 }
 0x26c   : > { %v2167_v14 = vadd.f32 %v1051_v52, %v2118_v57 }
 0x26e   : > { %v1061_v23 = vpack.c.bf16 %v2167_v14, %v2167_v14 }
 0x270   : > { %1095 = vmatmul.mubr.bf16.vlgmr.msra.gmra.mrb[16].mxu0 %v1061_v23  ;;  %1583 = vmatmul.mubr.bf16.vlgmr.msra.gmra.mrb[12].mxu1 %v1061_v23 }
 0x271   : > { %1185 = vmatpush1.bf16.msra.mxu0 %v1892_v27  ;;  %1587 = vmatpush3.bf16.msra.mxu1 %v1926_v34 }
 0x272   : > { %1186 = vmatprep.subr.bf16.mxu0 %v1897_v28  ;;  %1588 = vmatprep.subr.bf16.mxu1 %v1734_v37 }
 0x273   : > { %1216 = vmatprep.mubr.bf16.mxu0 %v1733_v3  ;;  %1602 = vmatprep.mubr.msk.bf16.mxu1 %vm1735_vm0, %v1734_v37 }
 0x275   : > { %1187 = vmatpush1.bf16.msra.mxu0 %v1907_v30  ;;  %1589 = vmatpush3.bf16.msra.mxu1 %v1946_v39 }
 0x276   : > { %1188 = vmatprep.subr.bf16.mxu0 %v1913_v31  ;;  %1590 = vmatprep.subr.bf16.mxu1 %v1734_v37 }
 0x279   : > { %1189 = vmatpush1.bf16.msra.mxu0 %v1918_v32  ;;  %1591 = vmatpush3.bf16.msra.mxu1 %v1969_v43 }
 0x27a   : > { %1190 = vmatprep.subr.bf16.mxu0 %v1933_v36  ;;  %1592 = vmatprep.subr.bf16.mxu1 %v1734_v37 }
 0x27d   : > { %1191 = vmatpush1.bf16.msra.mxu0 %v1940_v38  ;;  %1593 = vmatpush3.bf16.msra.mxu1 %v1988_v46 }
 0x27e   : > { %1192 = vmatprep.subr.bf16.mxu0 %v1953_v41  ;;  %1594 = vmatprep.subr.bf16.mxu1 %v1734_v37 }
 0x281   : > { %1193 = vmatpush1.bf16.msra.mxu0 %v1963_v42  ;;  %1595 = vmatpush3.bf16.msra.mxu1 %v2007_v49 }
 0x282   : > { %1194 = vmatprep.subr.bf16.mxu0 %v1975_v44  ;;  %1596 = vmatprep.subr.bf16.mxu1 %v1734_v37 }
 0x285   : > { %1195 = vmatpush1.bf16.msra.mxu0 %v1982_v45  ;;  %1597 = vmatpush3.bf16.msra.mxu1 %v2028_v53 }
 0x286   : > { %1196 = vmatprep.subr.bf16.mxu0 %v1994_v47  ;;  %1598 = vmatprep.subr.bf16.mxu1 %v1734_v37 }
 0x289   : > { %1197 = vmatpush1.bf16.msra.mxu0 %v2001_v48  ;;  %1599 = vmatpush3.bf16.msra.mxu1 %v2039_v55 }
 0x28a   : > { %1198 = vmatprep.subr.bf16.mxu0 %v2013_v50  ;;  %1600 = vmatprep.subr.bf16.mxu1 %v1734_v37 }
 0x28d   : > { %1199 = vmatpush1.bf16.msra.mxu0 %v2020_v51  ;;  %1601 = vmatpush3.bf16.msra.mxu1 %v2047_v56 }
 0x343   : > { %v1096_v3 = vpop.f32.mrb[16].mxu0  ;;  %v1137_v27 = vpop.f32.mrb[12].mxu1 }
 0x344   : > { %v1143_v28 = vadd.f32 %v1096_v3, %v2094_v11  ;;  %v1098_v30 = vpop.f32.mrb[17].mxu0  ;;  %v1584_v31 = vpop.f32.mrb[13].mxu1  ;;  %v1157_v45 = vadd.f32 %v2111_v62, %v1137_v27 }
 0x345   : > { %v1150_v32 = vadd.f32 %v1098_v30, %v2098_v15  ;;  %v1100_v34 = vpop.f32.mrb[18].mxu0  ;;  %v1140_v36 = vpop.f32.mrb[14].mxu1 }
 0x346   : > { %v1450_v38 = vmul.f32 -1.442695, %v1143_v28  ;;  %v1101_v39 = vpop.f32.mrb[19].mxu0  ;;  %v1585_v41 = vpop.f32.mrb[15].mxu1 }
 0x347   : > { %v1451_v42 = vmul.f32 -1.442695, %v1150_v32  ;;  %v1167_v11 = vpop.permute.xlu1 %1166 }
 0x348   : > { %1705 = vpow2.f32 %v1450_v38 }
 0x349   : > { %1707 = vpow2.f32 %v1451_v42 }
 0x34b   : > { %v1289_v40 = vpop.permute.xlu1 %1288 }
 0x352   : > { %v1706_v37 = vpop.eup %1705 }
 0x353   : > { %v1147_v43 = vadd.f32 1.0, %v1706_v37  ;;  %v1708_v44 = vpop.eup %1707 }
 0x354   : > { %v1154_v49 = vadd.f32 1.0, %v1708_v44 }
 0x355   : > { %1709 = vrcp.f32 %v1147_v43 }
 0x35f   : > { %v1710_v46 = vpop.eup %1709 }
 0x360   : > { %v1158_v47 = vmul.f32 %v1710_v46, %v1157_v45 }
 0x362   : > { %v1159_v48 = vadd.f32 %v1158_v47, %v2096_v13 }
 0x364   : > { %1711 = vtanh.f32 %v1159_v48 }
 0x365   : > { %1713 = vrcp.f32 %v1154_v49 }
 0x36e   : > { %v1712_v50 = vpop.eup %1711 }
 0x36f   : > { %v1161_v51 = vsub.f32 %v2167_v14, %v1712_v50  ;;  %v1714_v53 = vpop.eup %1713 }
 0x371   : > { %v1162_v55 = vmul.f32 %v1714_v53, %v1161_v51 }
 0x373   : > { %v1163_v56 = vadd.f32 %v1712_v50, %v1162_v55 }
 0x375   : > { %v1169_v15 = vmul.f32 %v1167_v11, %v1163_v56  ;;  %v1172_v57 = vsub.f32 %v1163_v56, %v2167_v14 }
 0x377   : > { %1452 = vst [vmem:[%s1805_s18 + $0x10] sm:$0xff] %v1169_v15  ;;  %v1173_v58 = vmul.f32 %v1172_v57, %v1167_v11 }
 0x379   : > { %v1174_v59 = vadd.f32 %v1173_v58, %v2167_v14 }
 0x37b   : > { %v1183_v60 = vpack.c.bf16 %v1174_v59, %v1174_v59 }
 0x37d   : > { %1217 = vmatmul.mubr.bf16.vlgmr.msra.gmra.mrb[20].mxu0 %v1183_v60  ;;  %1603 = vmatmul.mubr.bf16.vlgmr.msra.gmra.mrb[16].mxu1 %v1183_v60 }
 0x450   : > { %v1218_v13 = vpop.f32.mrb[20].mxu0  ;;  %v1259_v61 = vpop.f32.mrb[16].mxu1 }
 0x451   : > { %v1265_v1 = vadd.f32 %v1218_v13, %v2100_v18  ;;  %v1220_v4 = vpop.f32.mrb[21].mxu0  ;;  %v1604_v6 = vpop.f32.mrb[17].mxu1  ;;  %v1279_v19 = vadd.f32 %v2111_v62, %v1259_v61 }
 0x452   : > { %v1272_v9 = vadd.f32 %v1220_v4, %v2104_v22  ;;  %v1222_v63 = vpop.f32.mrb[22].mxu0  ;;  %v1262_v0 = vpop.f32.mrb[18].mxu1 }
 0x453   : > { %v1454_v2 = vmul.f32 -1.442695, %v1265_v1  ;;  %v1223_v25 = vpop.f32.mrb[23].mxu0  ;;  %v1605_v10 = vpop.f32.mrb[19].mxu1 }
 0x454   : > { %v1455_v12 = vmul.f32 -1.442695, %v1272_v9 }
 0x455   : > { %1715 = vpow2.f32 %v1454_v2 }
 0x456   : > { %1717 = vpow2.f32 %v1455_v12 }
 0x45f   : > { %v1716_v16 = vpop.eup %1715 }
 0x460   : > { %v1269_v17 = vadd.f32 1.0, %v1716_v16  ;;  %v1718_v5 = vpop.eup %1717 }
 0x461   : > { %v1276_v22 = vadd.f32 1.0, %v1718_v5 }
 0x462   : > { %1719 = vrcp.f32 %v1269_v17 }
 0x46c   : > { %v1720_v18 = vpop.eup %1719 }
 0x46d   : > { %v1280_v21 = vmul.f32 %v1720_v18, %v1279_v19 }
 0x46f   : > { %v1281_v7 = vadd.f32 %v1280_v21, %v2102_v20 }
 0x471   : > { %1721 = vtanh.f32 %v1281_v7 }
 0x472   : > { %1723 = vrcp.f32 %v1276_v22 }
 0x47b   : > { %v1722_v24 = vpop.eup %1721 }
 0x47c   : > { %v1283_v26 = vsub.f32 %v1174_v59, %v1722_v24  ;;  %v1724_v29 = vpop.eup %1723 }
 0x47e   : > { %v1284_v33 = vmul.f32 %v1724_v29, %v1283_v26 }
 0x480   : > { %v1285_v35 = vadd.f32 %v1722_v24, %v1284_v33 }
 0x482   : > { %v1291_v54 = vmul.f32 %v1289_v40, %v1285_v35  ;;  %v1294_v8 = vsub.f32 %v1285_v35, %v1174_v59  ;;  %1301 = sbr.rel (%p1457_p5) target bundleno = 1161 (0x489), region = 56 }
 0x484   : > { %1456 = vst [vmem:[%s1805_s18 + $0x18] sm:$0xff] %v1291_v54  ;;  %v1295_v52 = vmul.f32 %v1294_v8, %v1289_v40 }
 0x486   : > { %v1296_v14 = vadd.f32 %v1295_v52, %v1174_v59 }
 0x488   : > { %1297 = vst [vmem:[#allocation3] sm:$0xff] %v1296_v14  ;;  %1302 = vst [vmem:[%s2232_s8] sm:$0xff] (!%p1457_p5), %v1296_v14 }
 0x489 PF: > { %s19_s27 = sadd.s32 1, %s1731_s27  }
 0x48a   : > { %p16_p6 = scmp.ge.s32.totalorder %s19_s27, 4  }
 0x48c   :  { %18 = sbr.rel (!%p16_p6) target bundleno = 1 (0x1), region = 107 }

</bundles_post_ra>
